<compile_context>
chip_gen: v6e
topology: v6e:2x2x1
jax: 0.10.0
libtpu: 0.0.40
codegen_flags: <defaults>
</compile_context>

<pallas_src>
import jax
import jax.numpy as jnp
from jax.experimental import pallas as pl
from jax.experimental.pallas import tpu as pltpu

_LANE = 128   # lane width: last dim of every block
_SUB = 8      # f32 sublane count: accumulator is one (8, 128) vreg per core
_MIN_TM = 32  # keeps tm legal for f32 / bf16 / int8 sublane packing


def _device_kind() -> str:
    try:
        return jax.devices()[0].device_kind.lower()
    except Exception:
        return ""


def _cores_per_chip(kind: str) -> int:
    # Single-TensorCore devices (v5e / v6e "lite" chips): a 2-way "parallel"
    # axis is just a serial loop that inflates padding, so collapse it.
    if "lite" in kind or "v5e" in kind or "v6e" in kind:
        return 1
    # v4 / v5p megacore and v7x expose two TensorCores worth sharding across.
    return 2


def _block_bytes(kind: str) -> int:
    # Keep the double-buffered input block under the default scoped-VMEM
    # limit: 16 MiB on v5e, 32 MiB on v6e / v7x / v5p.
    if "v5" in kind and ("lite" in kind or "v5e" in kind):
        return 4 * 1024 * 1024
    return 8 * 1024 * 1024


def _make_sum_kernel(rows, tm, chunks_per_core, ragged):
    """Kernel that sums (tm, 128) tiles into a per-core (1, 8, 128) slab."""

    def kernel(x_ref, o_ref):
        j = pl.program_id(1)

        @pl.when(j == 0)
        def _():
            o_ref[...] = jnp.zeros_like(o_ref)

        def _accum(tile):
            # Fold the tile into one (8,128) vreg with pure VPU adds
            # (tile-aligned reshape, no cross-lane traffic); the final scalar
            # reduce happens once in the wrapper.
            o_ref[...] += tile.reshape(-1, _SUB, _LANE).sum(axis=0)[None]

        if not ragged:
            _accum(x_ref[...].astype(jnp.float32))
        else:
            # Logical (unclamped) block index: the input index_map clamps the
            # DMA in-bounds; the mask below zeroes any rows past `rows`.
            blk = pl.program_id(0) * chunks_per_core + j
            valid = rows - blk * tm

            @pl.when(valid >= tm)      # full block: no masking cost
            def _():
                _accum(x_ref[...].astype(jnp.float32))

            @pl.when(valid < tm)       # partial / duplicate block: mask rows
            def _():
                row_ids = jax.lax.broadcasted_iota(jnp.int32, (tm, _LANE), 0)
                tile = x_ref[...].astype(jnp.float32)
                _accum(jnp.where(row_ids < valid, tile, 0.0))

    return kernel


def _global_sum(x):
    """Sum of all elements of x (any shape / float dtype), accumulated in f32."""
    total = x.size
    flat = x.reshape(-1)

    lane_rows = total // _LANE
    lane_rem = total - lane_rows * _LANE

    # Sub-128-element tail: summed on the wrapper side (negligible) so the
    # main 2-D view stays a zero-copy bitcast whenever x.size % 128 == 0.
    tail_sum = jnp.float32(0.0)
    if lane_rem:
        tail_sum = jnp.sum(flat[lane_rows * _LANE:].astype(jnp.float32))
        flat = flat[: lane_rows * _LANE]

    if lane_rows == 0:
        return tail_sum

    # Tiny inputs only: pad the row count up to one minimal block (< 16 KiB).
    if lane_rows < _MIN_TM:
        flat = jnp.pad(flat, (0, (_MIN_TM - lane_rows) * _LANE))
        lane_rows = _MIN_TM

    kind = _device_kind()
    itemsize = jnp.dtype(x.dtype).itemsize
    tm_target = max(_MIN_TM,
                    (_block_bytes(kind) // (_LANE * itemsize)) // _MIN_TM * _MIN_TM)
    tm = max(_MIN_TM, min(tm_target, (lane_rows // _MIN_TM) * _MIN_TM))

    n_blocks = pl.cdiv(lane_rows, tm)
    ncores = min(_cores_per_chip(kind), n_blocks)
    chunks_per_core = pl.cdiv(n_blocks, ncores)
    ragged = ncores * chunks_per_core * tm != lane_rows

    x2d = flat.reshape(lane_rows, _LANE)

    def in_map(p, j):
        blk = p * chunks_per_core + j
        if ragged:
            blk = jnp.minimum(blk, n_blocks - 1)   # keep the DMA in bounds
        return (blk, 0)

    partials = pl.pallas_call(
        _make_sum_kernel(lane_rows, tm, chunks_per_core, ragged),
        out_shape=jax.ShapeDtypeStruct((ncores, _SUB, _LANE), jnp.float32),
        grid_spec=pltpu.PrefetchScalarGridSpec(
            num_scalar_prefetch=0,
            grid=(ncores, chunks_per_core),
            in_specs=[pl.BlockSpec((tm, _LANE), in_map)],
            out_specs=pl.BlockSpec((1, _SUB, _LANE), lambda p, j: (p, 0, 0)),
        ),
        compiler_params=pltpu.CompilerParams(
            dimension_semantics=("parallel", "arbitrary"),
        ),
        cost_estimate=pl.CostEstimate(
            flops=lane_rows * _LANE,
            transcendentals=0,
            bytes_accessed=lane_rows * _LANE * itemsize + ncores * _SUB * _LANE * 4,
        ),
    )(x2d)

    return jnp.sum(partials) + tail_sum


def encoder_forward(x, alpha, w):
    """x: float (N, C, D, H, W); alpha: (2,); w: (1, 1). Returns shape (1,)."""
    total_sum = _global_sum(x)
    # O(1) epilogue (exact match of the PyTorch module), free in XLA:
    p = jax.nn.softmax(alpha.astype(jnp.float32))
    coeff = 2.0 * p[0] + 4.0 * p[1]                 # 2*a1 + 4*a2
    y = coeff * total_sum / jnp.float32(x.size)     # mean over all five dims
    return (y * w.astype(jnp.float32).reshape(())).reshape(1)  # Linear(1,1,bias=False)


if __name__ == "__main__":
    key = jax.random.PRNGKey(0)
    kx1, kx2, kx3, kx4, kw = jax.random.split(key, 5)

    # Deterministic parameters: alpha = zeros(2) (as in __init__),
    # Linear(1, 1, bias=False) weight from the PRNG.
    alpha = jnp.zeros((2,), dtype=jnp.float32)
    w = jax.random.uniform(kw, (1, 1), dtype=jnp.float32, minval=-1.0, maxval=1.0)

    cases = [
        # small 5-D shape consistent with the module, 128-aligned, f32
        jax.random.uniform(kx1, (2, 1, 16, 16, 16), dtype=jnp.float32),
        # ragged last block (rows not a multiple of tm) -> in-kernel masking
        jax.random.uniform(kx2, (2, 1, 15, 16, 16), dtype=jnp.float32),
        # bf16 input -> in-kernel upcast path
        jax.random.uniform(kx3, (2, 1, 16, 16, 16), dtype=jnp.float32).astype(jnp.bfloat16),
        # not a multiple of 128 -> wrapper-side sub-lane tail + tiny-pad path
        jax.random.uniform(kx4, (3, 1, 7, 11, 5), dtype=jnp.float32),
    ]

    for x in cases:
        out = jax.block_until_ready(encoder_forward(x, alpha, w))
        xf = x.astype(jnp.float32)
        p = jax.nn.softmax(alpha)
        ref = ((2.0 * p[0] * xf + 4.0 * p[1] * xf).mean() * w[0, 0]).reshape(1)
        assert jnp.allclose(out, ref, rtol=1e-5, atol=1e-6), (x.shape, x.dtype, out, ref)

    print("KERNEL_OK")
</pallas_src>

<mosaic_0001>
module attributes {stable_mosaic.version = 11 : i64} {
  func.func @kernel(%arg0: i32, %arg1: i32, %arg2: memref<64x128xf32, #tpu.memory_space<vmem>>, %arg3: memref<1x8x128xf32, #tpu.memory_space<vmem>>) attributes {dimension_semantics = [#tpu.dimension_semantics<parallel>, #tpu.dimension_semantics<arbitrary>], iteration_bounds = array<i64: 1, 1>, scalar_prefetch = 0 : i64, scratch_operands = 0 : i64, tpu.core_type = #tpu.core_type<tc>, window_params = [{transform_indices = @transform_0, window_bounds = array<i64: 64, 128>}, {transform_indices = @transform_1, window_bounds = array<i64: 1, 8, 128>}]} {
    %c0_i32 = arith.constant 0 : i32
    %0 = arith.cmpi eq, %arg1, %c0_i32 : i32
    %1 = arith.extui %0 : i1 to i32
    %c0_i32_0 = arith.constant 0 : i32
    %2 = arith.cmpi ne, %1, %c0_i32_0 : i32
    scf.if %2 {
      %cst_8 = arith.constant 0.000000e+00 : f32
      %10 = vector.broadcast %cst_8 : f32 to vector<1x8x128xf32>
      %c0_9 = arith.constant 0 : index
      %c0_10 = arith.constant 0 : index
      %c0_11 = arith.constant 0 : index
      %11 = vector.load %arg3[%c0_9, %c0_10, %c0_11] : memref<1x8x128xf32, #tpu.memory_space<vmem>>, vector<1x8x128xf32>
      tpu.vector_store %arg3[%c0_9, %c0_10, %c0_11], %10 {strides = array<i32>} : memref<1x8x128xf32, #tpu.memory_space<vmem>>, vector<1x8x128xf32>,
    } else {
    }
    %c0 = arith.constant 0 : index
    %c0_1 = arith.constant 0 : index
    %3 = vector.load %arg2[%c0, %c0_1] : memref<64x128xf32, #tpu.memory_space<vmem>>, vector<64x128xf32>
    %c0_2 = arith.constant 0 : index
    %c0_3 = arith.constant 0 : index
    %c0_4 = arith.constant 0 : index
    %4 = vector.load %arg3[%c0_2, %c0_3, %c0_4] : memref<1x8x128xf32, #tpu.memory_space<vmem>>, vector<1x8x128xf32>
    %5 = vector.shape_cast %3 : vector<64x128xf32> to vector<8x8x128xf32>
    %cst = arith.constant dense<0.000000e+00> : vector<8x128xf32>
    %6 = vector.multi_reduction <add>, %5, %cst [0] : vector<8x8x128xf32> to vector<8x128xf32>
    %7 = vector.shape_cast %6 : vector<8x128xf32> to vector<1x8x128xf32>
    %8 = arith.addf %4, %7 : vector<1x8x128xf32>
    %c0_5 = arith.constant 0 : index
    %c0_6 = arith.constant 0 : index
    %c0_7 = arith.constant 0 : index
    %9 = vector.load %arg3[%c0_5, %c0_6, %c0_7] : memref<1x8x128xf32, #tpu.memory_space<vmem>>, vector<1x8x128xf32>
    tpu.vector_store %arg3[%c0_5, %c0_6, %c0_7], %8 {strides = array<i32>} : memref<1x8x128xf32, #tpu.memory_space<vmem>>, vector<1x8x128xf32>,
    return
  }
  func.func @transform_0(%arg0: i32, %arg1: i32) -> (i32, i32) {
    %c1_i32 = arith.constant 1 : i32
    %0 = arith.muli %arg0, %c1_i32 : i32
    %1 = arith.addi %0, %arg1 : i32
    %c0_i32 = arith.constant 0 : i32
    %c0_i32_0 = arith.constant 0 : i32
    return %1, %c0_i32 : i32, i32
  }
  func.func @transform_1(%arg0: i32, %arg1: i32) -> (i32, i32, i32) {
    %c0_i32 = arith.constant 0 : i32
    %c0_i32_0 = arith.constant 0 : i32
    %c0_i32_1 = arith.constant 0 : i32
    return %arg0, %c0_i32, %c0_i32_0 : i32, i32, i32
  }
}

</mosaic_0001>

<bundles_post_ra>
// kernel: tpu_custom_call.1
= control target key start
LH: loop header
LB: loop body
LE: loop exit
PB: predicated region body
PF: predicated region fallthrough
CT: control target
= control target key end

     0   :  { %6 = vsyncpa [#allocation3], 0  ;;  %s136_s0 = inlined_call_operand.hbm [shape: f32[64,128], index: 0, kind: input, shape index: {}]   ;;  %s137_s1 = inlined_call_operand.hbm [shape: f32[1,8,128], index: 1, kind: output, shape index: {}]  }
   0x1   :  { %7 = vsyncpa [#allocation4], 0  ;;  %s116_s6 = smov [#allocation2]  }
   0x2   :  { %s17_s7 = sshll.u32 %s116_s6, 4  ;;  %s18_s7 = int_to_ptr.vmem [resolvable:$true] %s17_s7 }
   0x3   :  { %s80_s8 = scalar_lea.vmem %s18_s7, 1024  ;;  %p85_p1 = scmp.lt.s32.totalorder %s18_s7, %s18_s7 }
   0x4   :  { %p81_p0 = scmp.ne.s32.totalorder %s18_s7, %s80_s8  ;;  %p86_p2 = scmp.lt.s32.totalorder %s80_s8, %s80_s8 }
   0x6   :  { %p87_p3 = por %p86_p2, %p85_p1 }
   0x8   :  { %p88_p4 = pnand %p87_p3, %p81_p0 }
   0xa   :  { %91 = shalt.err (!%p88_p4)
}
   0xb   :  { %s117_s9 = smov 128   ;;  %s118_s10 = smov 8  }
   0xc   :  { %23 = dma.hbm_to_vmem [thread:$0]  %s136_s0, 1024, %s18_s7, [#allocation3], %s117_s9, %s117_s9, %s118_s10  }
   0xd   :  { %112 = dma.done.wait [#allocation3], 1024  }
   0xe   :  { %113 = vsyncadd [#allocation3], 4294966272  ;;  %v34_v0 = vld [vmem:[#allocation2] sm:$0xff]  ;;  %v35_v1 = vld [vmem:[#allocation2 + $0x8] sm:$0xff]  ;;  %s119_s13 = smov [#allocation5]  }
   0xf   :  { %v36_v2 = vld [vmem:[#allocation2 + $0x10] sm:$0xff]  ;;  %v43_v3 = vadd.f32 %v35_v1, %v34_v0  ;;  %v37_v4 = vld [vmem:[#allocation2 + $0x18] sm:$0xff]  ;;  %v38_v6 = vld [vmem:[#allocation2 + $0x20] sm:$0xff]  ;;  %s58_s14 = sshll.u32 %s119_s13, 4  ;;  %s59_s14 = int_to_ptr.vmem [resolvable:$true] %s58_s14 }
  0x10   :  { %v39_v8 = vld [vmem:[#allocation2 + $0x28] sm:$0xff]  ;;  %v40_v10 = vld [vmem:[#allocation2 + $0x30] sm:$0xff]  ;;  %v41_v12 = vld [vmem:[#allocation2 + $0x38] sm:$0xff]  ;;  %s92_s0 = scalar_lea.vmem %s59_s14, 128  ;;  %p97_p6 = scmp.lt.s32.totalorder %s59_s14, %s59_s14 }
  0x11   :  { %v44_v5 = vadd.f32 %v43_v3, %v36_v2  ;;  %p93_p5 = scmp.ne.s32.totalorder %s59_s14, %s92_s0  ;;  %p98_p7 = scmp.lt.s32.totalorder %s92_s0, %s92_s0 }
  0x13   :  { %v45_v7 = vadd.f32 %v44_v5, %v37_v4  ;;  %p99_p8 = por %p98_p7, %p97_p6 }
  0x15   :  { %v46_v9 = vadd.f32 %v45_v7, %v38_v6  ;;  %p100_p9 = pnand %p99_p8, %p93_p5 }
  0x17   :  { %v47_v11 = vadd.f32 %v46_v9, %v39_v8 }
  0x19   :  { %v48_v13 = vadd.f32 %v47_v11, %v40_v10 }
  0x1b   :  { %v49_v14 = vadd.f32 %v48_v13, %v41_v12 }
  0x1d   :  { %51 = vst [vmem:[#allocation5] sm:$0xff] %v49_v14 }
  0x1e   :  { %103 = shalt.err (!%p100_p9)
}
  0x1f   :  { %61 = dma.vmem_to_hbm [thread:$0]  %s59_s14, 128, %s137_s1, [#allocation4]  }
  0x20   :  { %114 = dma.done.wait [#allocation4], 128  }
  0x21   :  { %115 = vsyncadd [#allocation4], 4294967168 }
  0x22   :  { %65 = vsyncpa [#allocation3], 1 }
  0x23   :  { %66 = vsyncpa [#allocation4], 1 }

</bundles_post_ra>
